<compile_context>
chip_gen: v5e
topology: v5e:2x2
jax: 0.10.0
libtpu: 0.0.40
codegen_flags: <defaults>
</compile_context>

<pallas_src>
import functools

import jax
import jax.numpy as jnp
from jax.experimental import pallas as pl
from jax.experimental.pallas import tpu as pltpu

_LANE = 128         # lane width (last-dim granularity)
_MAX_TILE_M = 1024  # max batch rows processed per grid step
_NUM_SPLITS = 2     # independent batch sub-streams inside one tile


def _round_up(x, m):
    return (x + m - 1) // m * m


def _choose_tile_m(batch, row_align, max_tile):
    """Pick the batch tile size.

    Priority: (1) minimal batch-padding waste, (2) largest tile (amortizes the
    ~0.35 us per-grid-step overhead), (3) prefer >=2 grid steps when it does
    not force a much smaller tile (so v7x can shard the batch over 2 TCs).
    """
    min_padded = _round_up(batch, row_align)
    limit = min(max_tile, min_padded)
    cands = []
    t = row_align
    while t <= limit:
        cands.append((_round_up(batch, t), t))
        t += row_align
    best_padded = min(p for p, _ in cands)
    tiles = [t for p, t in cands if p == best_padded]
    t_big = max(tiles)
    multi = [t for t in tiles if best_padded // t >= 2]
    if multi and 2 * max(multi) >= t_big:
        return max(multi)
    return t_big


def _icm_mlp_kernel(num_splits, x_ref, *refs):
    """Fused 6-layer MLP: relu(Linear) x5 then Linear (no activation)."""
    out_ref = refs[-1]
    ws = refs[0:-1:2]
    bs = refs[1:-1:2]
    n_layers = len(ws)
    cdt = ws[0].dtype

    tile_m = x_ref.shape[0]
    sub = tile_m // num_splits  # static; aligned to the packed-sublane size

    def mlp(h):
        h = h.astype(cdt)  # cast in-kernel (input may arrive as f32)
        for li in range(n_layers):
            acc = jnp.dot(h, ws[li][...], preferred_element_type=jnp.float32)
            acc = acc + bs[li][...]              # bias-add in f32
            if li < n_layers - 1:
                # cast-then-ReLU == ReLU-then-cast; runs the max on packed
                # low-precision vregs (bf16 VALU on v6e/v7x, neutral on v5e).
                h = jnp.maximum(acc.astype(cdt), 0)
            else:
                h = acc                          # final layer: no activation
        return h

    # Independent sub-batch streams keep >=2 matmul chains in flight (hides
    # the MRF drain latency on v5e/v6e).  Each split stores directly into its
    # slice of the output tile: no concatenate, lower vreg/VMEM pressure.
    for s in range(num_splits):
        y = mlp(x_ref[s * sub:(s + 1) * sub, :])
        out_ref[s * sub:(s + 1) * sub, :] = y.astype(out_ref.dtype)


def prepare_icm_params(params, compute_dtype=jnp.bfloat16):
    """One-time lane-padding + cast of the six (W, b) pairs.

    W is (in, out); b is (out,) or (1, out).  Layer-0's input dim stays
    UNPADDED (the kernel consumes x at its natural feature width); every other
    layer boundary is zero-padded to a multiple of 128 lanes so hidden
    activations and the output tile are lane-dense.  Build once, reuse.
    """
    assert len(params) == 6, "ICM_network has exactly 6 linear layers"
    dims = [params[0][0].shape[0]] + [w.shape[1] for w, _ in params]
    pdims = [dims[0]] + [_round_up(d, _LANE) for d in dims[1:]]
    weights, biases = [], []
    for li, (w, b) in enumerate(params):
        w_p = jnp.zeros((pdims[li], pdims[li + 1]), compute_dtype)
        w_p = w_p.at[:w.shape[0], :w.shape[1]].set(w.astype(compute_dtype))
        b_p = jnp.zeros((1, pdims[li + 1]), jnp.float32)
        b_p = b_p.at[0, :w.shape[1]].set(b.reshape(-1).astype(jnp.float32))
        weights.append(w_p)
        biases.append(b_p)
    return {"weights": tuple(weights), "biases": tuple(biases),
            "outsize": int(dims[-1])}


@functools.partial(jax.jit, static_argnames=("outsize",))
def _icm_forward_padded(x, weights, biases, *, outsize):
    batch = x.shape[0]
    insize = weights[0].shape[0]
    assert x.shape[1] == insize
    cdt = weights[0].dtype            # compute dtype (bf16 or f32)
    pdims = [insize] + [w.shape[1] for w in weights]
    out_pdim = pdims[-1]

    # ---- batch tiling -------------------------------------------------------
    row_align = 16 if cdt.itemsize == 2 else 8     # packed-sublane granularity
    tile_m = _choose_tile_m(batch, row_align, _MAX_TILE_M)
    padded_batch = _round_up(batch, tile_m)
    grid = (padded_batch // tile_m,)

    # 2-way intra-tile split only when each sub-stream stays on packed-vreg
    # row boundaries; tiny tiles run unsplit (no mid-vreg relayouts).
    split_align = _NUM_SPLITS * row_align
    num_splits = _NUM_SPLITS if (tile_m >= split_align and
                                 tile_m % split_align == 0) else 1

    # Pad only the batch axis, and only when needed.  The feature axis is
    # never padded in the wrapper (that was an extra HBM pass + ~4x input
    # read inflation).  When no pad is needed, x goes straight to the kernel.
    if padded_batch != batch:
        x_in = jnp.zeros((padded_batch, insize), cdt)
        x_in = x_in.at[:batch, :].set(x.astype(cdt))
    else:
        x_in = x

    flat_args = [x_in]
    in_specs = [pl.BlockSpec((tile_m, insize), lambda i: (i, 0))]
    for w_p, b_p in zip(weights, biases):
        flat_args += [w_p, b_p]
        # Constant block index -> weights/biases stay resident in VMEM across
        # the whole batch grid.
        in_specs += [pl.BlockSpec(w_p.shape, lambda i: (0, 0)),
                     pl.BlockSpec(b_p.shape, lambda i: (0, 0))]

    # Output stored in the compute dtype: bf16 halves the dominant HBM write
    # stream; the f32 compute path keeps an f32 output for tight checks.
    out_dtype = cdt
    out_shape = jax.ShapeDtypeStruct((padded_batch, out_pdim), out_dtype)
    out_spec = pl.BlockSpec((tile_m, out_pdim), lambda i: (i, 0))

    # VMEM budget from actual buffer sizes (double-buffered I/O tiles, resident
    # weights, f32 activation headroom), capped well below v7x's 64 MiB.
    w_bytes = sum(int(w.size) * w.dtype.itemsize for w in weights)
    b_bytes = sum(int(b.size) * 4 for b in biases)
    io_bytes = (tile_m * insize * x_in.dtype.itemsize
                + tile_m * out_pdim * out_dtype.itemsize)
    act_bytes = tile_m * max(pdims[1:]) * 4
    need = 2 * (w_bytes + b_bytes) + 2 * io_bytes + 8 * act_bytes
    vmem_bytes = int(min(max(need + (2 << 20), 16 << 20), 48 << 20))

    y_padded = pl.pallas_call(
        functools.partial(_icm_mlp_kernel, num_splits),
        out_shape=out_shape,
        grid=grid,
        in_specs=in_specs,
        out_specs=out_spec,
        compiler_params=pltpu.CompilerParams(
            dimension_semantics=("parallel",),   # v7x: shard batch over 2 TCs
            vmem_limit_bytes=vmem_bytes),
    )(*flat_args)

    return y_padded[:batch, :outsize].astype(x.dtype)


def icm_forward(x, prepared):
    """Forward pass of ICM_network: 5 x (Linear + ReLU) then Linear."""
    return _icm_forward_padded(x, prepared["weights"], prepared["biases"],
                               outsize=prepared["outsize"])


def init_icm_params(key, insize, hidden_size, outsize):
    """Deterministic init mimicking nn.Linear default (uniform +-1/sqrt(fan_in)).

    Returns list of 6 (W, b) with W shaped (in, out) and b shaped (1, out), f32.
    """
    dims = [insize] + [hidden_size] * 5 + [outsize]
    params = []
    for i in range(6):
        fan_in, fan_out = dims[i], dims[i + 1]
        key, kw, kb = jax.random.split(key, 3)
        bound = 1.0 / jnp.sqrt(jnp.float32(fan_in))
        w = jax.random.uniform(kw, (fan_in, fan_out), jnp.float32, -bound, bound)
        b = jax.random.uniform(kb, (1, fan_out), jnp.float32, -bound, bound)
        params.append((w, b))
    return params


def icm_forward_ref(x, params):
    """Plain-JAX f32 reference for correctness check."""
    h = x
    for i, (w, b) in enumerate(params):
        h = h @ w + b
        if i < 5:
            h = jnp.maximum(h, 0.0)
    return h


# TODO(synk): the module's Adam optimizer / MSELoss are training-time state,
# not part of forward(), and are intentionally not implemented in the kernel.

if __name__ == "__main__":
    insize, hidden_size, outsize = 16, 32, 4
    batch = 8

    key = jax.random.PRNGKey(0)
    key, kx = jax.random.split(key)
    x = jax.random.normal(kx, (batch, insize), jnp.float32)
    params = init_icm_params(key, insize, hidden_size, outsize)

    y_ref = icm_forward_ref(x, params)

    # f32 compute path: should match the plain-JAX reference tightly.
    prep_f32 = prepare_icm_params(params, compute_dtype=jnp.float32)
    y_f32 = jax.block_until_ready(icm_forward(x, prep_f32))
    assert y_f32.shape == (batch, outsize)
    assert jnp.allclose(y_f32, y_ref, atol=1e-4, rtol=1e-4)

    # bf16 compute (default, MXU-native) with f32 accumulation: loose tolerance.
    prep_bf16 = prepare_icm_params(params, compute_dtype=jnp.bfloat16)
    y_bf16 = jax.block_until_ready(icm_forward(x, prep_bf16))
    assert y_bf16.shape == (batch, outsize)
    assert jnp.allclose(y_bf16, y_ref, atol=3e-2, rtol=3e-2)

    print("KERNEL_OK")
</pallas_src>

<mosaic_0001>
module attributes {stable_mosaic.version = 11 : i64} {
  func.func @_icm_mlp_kernel(%arg0: i32, %arg1: memref<8x16xf32, #tpu.memory_space<vmem>>, %arg2: memref<16x128xf32, #tpu.memory_space<vmem>>, %arg3: memref<1x128xf32, #tpu.memory_space<vmem>>, %arg4: memref<128x128xf32, #tpu.memory_space<vmem>>, %arg5: memref<1x128xf32, #tpu.memory_space<vmem>>, %arg6: memref<128x128xf32, #tpu.memory_space<vmem>>, %arg7: memref<1x128xf32, #tpu.memory_space<vmem>>, %arg8: memref<128x128xf32, #tpu.memory_space<vmem>>, %arg9: memref<1x128xf32, #tpu.memory_space<vmem>>, %arg10: memref<128x128xf32, #tpu.memory_space<vmem>>, %arg11: memref<1x128xf32, #tpu.memory_space<vmem>>, %arg12: memref<128x128xf32, #tpu.memory_space<vmem>>, %arg13: memref<1x128xf32, #tpu.memory_space<vmem>>, %arg14: memref<8x128xf32, #tpu.memory_space<vmem>>) attributes {dimension_semantics = [#tpu.dimension_semantics<parallel>], iteration_bounds = array<i64: 1>, scalar_prefetch = 0 : i64, scratch_operands = 0 : i64, tpu.core_type = #tpu.core_type<tc>, window_params = [{transform_indices = @transform_0, window_bounds = array<i64: 8, 16>}, {pipeline_mode = #tpu.pipeline_mode<synchronous>, transform_indices = @transform_1, window_bounds = array<i64: 16, 128>}, {pipeline_mode = #tpu.pipeline_mode<synchronous>, transform_indices = @transform_2, window_bounds = array<i64: 1, 128>}, {pipeline_mode = #tpu.pipeline_mode<synchronous>, transform_indices = @transform_3, window_bounds = array<i64: 128, 128>}, {pipeline_mode = #tpu.pipeline_mode<synchronous>, transform_indices = @transform_4, window_bounds = array<i64: 1, 128>}, {pipeline_mode = #tpu.pipeline_mode<synchronous>, transform_indices = @transform_5, window_bounds = array<i64: 128, 128>}, {pipeline_mode = #tpu.pipeline_mode<synchronous>, transform_indices = @transform_6, window_bounds = array<i64: 1, 128>}, {pipeline_mode = #tpu.pipeline_mode<synchronous>, transform_indices = @transform_7, window_bounds = array<i64: 128, 128>}, {pipeline_mode = #tpu.pipeline_mode<synchronous>, transform_indices = @transform_8, window_bounds = array<i64: 1, 128>}, {pipeline_mode = #tpu.pipeline_mode<synchronous>, transform_indices = @transform_9, window_bounds = array<i64: 128, 128>}, {pipeline_mode = #tpu.pipeline_mode<synchronous>, transform_indices = @transform_10, window_bounds = array<i64: 1, 128>}, {pipeline_mode = #tpu.pipeline_mode<synchronous>, transform_indices = @transform_11, window_bounds = array<i64: 128, 128>}, {pipeline_mode = #tpu.pipeline_mode<synchronous>, transform_indices = @transform_12, window_bounds = array<i64: 1, 128>}, {transform_indices = @transform_13, window_bounds = array<i64: 8, 128>}]} {
    %c0 = arith.constant 0 : index
    %c0_0 = arith.constant 0 : index
    %0 = vector.load %arg1[%c0, %c0_0] : memref<8x16xf32, #tpu.memory_space<vmem>>, vector<8x16xf32>
    %c0_1 = arith.constant 0 : index
    %c0_2 = arith.constant 0 : index
    %1 = vector.load %arg2[%c0_1, %c0_2] : memref<16x128xf32, #tpu.memory_space<vmem>>, vector<16x128xf32>
    %cst = arith.constant dense<0.000000e+00> : vector<8x128xf32>
    %2 = tpu.matmul %0, %1, %cst {dimension_numbers = #tpu.dot_dimension_numbers<[1], [0], [0], [1], [0, 0, 1, 1], [], []>} : vector<8x16xf32>, vector<16x128xf32>, vector<8x128xf32> -> vector<8x128xf32>
    %c0_3 = arith.constant 0 : index
    %c0_4 = arith.constant 0 : index
    %3 = vector.load %arg3[%c0_3, %c0_4] : memref<1x128xf32, #tpu.memory_space<vmem>>, vector<1x128xf32>
    %4 = vector.broadcast %3 : vector<1x128xf32> to vector<8x128xf32>
    %5 = arith.addf %2, %4 : vector<8x128xf32>
    %cst_5 = arith.constant 0.000000e+00 : f32
    %6 = vector.broadcast %cst_5 : f32 to vector<8x128xf32>
    %7 = arith.maximumf %5, %6 : vector<8x128xf32>
    %c0_6 = arith.constant 0 : index
    %c0_7 = arith.constant 0 : index
    %8 = vector.load %arg4[%c0_6, %c0_7] : memref<128x128xf32, #tpu.memory_space<vmem>>, vector<128x128xf32>
    %cst_8 = arith.constant dense<0.000000e+00> : vector<8x128xf32>
    %9 = tpu.matmul %7, %8, %cst_8 {dimension_numbers = #tpu.dot_dimension_numbers<[1], [0], [0], [1], [0, 0, 1, 1], [], []>} : vector<8x128xf32>, vector<128x128xf32>, vector<8x128xf32> -> vector<8x128xf32>
    %c0_9 = arith.constant 0 : index
    %c0_10 = arith.constant 0 : index
    %10 = vector.load %arg5[%c0_9, %c0_10] : memref<1x128xf32, #tpu.memory_space<vmem>>, vector<1x128xf32>
    %11 = vector.broadcast %10 : vector<1x128xf32> to vector<8x128xf32>
    %12 = arith.addf %9, %11 : vector<8x128xf32>
    %cst_11 = arith.constant 0.000000e+00 : f32
    %13 = vector.broadcast %cst_11 : f32 to vector<8x128xf32>
    %14 = arith.maximumf %12, %13 : vector<8x128xf32>
    %c0_12 = arith.constant 0 : index
    %c0_13 = arith.constant 0 : index
    %15 = vector.load %arg6[%c0_12, %c0_13] : memref<128x128xf32, #tpu.memory_space<vmem>>, vector<128x128xf32>
    %cst_14 = arith.constant dense<0.000000e+00> : vector<8x128xf32>
    %16 = tpu.matmul %14, %15, %cst_14 {dimension_numbers = #tpu.dot_dimension_numbers<[1], [0], [0], [1], [0, 0, 1, 1], [], []>} : vector<8x128xf32>, vector<128x128xf32>, vector<8x128xf32> -> vector<8x128xf32>
    %c0_15 = arith.constant 0 : index
    %c0_16 = arith.constant 0 : index
    %17 = vector.load %arg7[%c0_15, %c0_16] : memref<1x128xf32, #tpu.memory_space<vmem>>, vector<1x128xf32>
    %18 = vector.broadcast %17 : vector<1x128xf32> to vector<8x128xf32>
    %19 = arith.addf %16, %18 : vector<8x128xf32>
    %cst_17 = arith.constant 0.000000e+00 : f32
    %20 = vector.broadcast %cst_17 : f32 to vector<8x128xf32>
    %21 = arith.maximumf %19, %20 : vector<8x128xf32>
    %c0_18 = arith.constant 0 : index
    %c0_19 = arith.constant 0 : index
    %22 = vector.load %arg8[%c0_18, %c0_19] : memref<128x128xf32, #tpu.memory_space<vmem>>, vector<128x128xf32>
    %cst_20 = arith.constant dense<0.000000e+00> : vector<8x128xf32>
    %23 = tpu.matmul %21, %22, %cst_20 {dimension_numbers = #tpu.dot_dimension_numbers<[1], [0], [0], [1], [0, 0, 1, 1], [], []>} : vector<8x128xf32>, vector<128x128xf32>, vector<8x128xf32> -> vector<8x128xf32>
    %c0_21 = arith.constant 0 : index
    %c0_22 = arith.constant 0 : index
    %24 = vector.load %arg9[%c0_21, %c0_22] : memref<1x128xf32, #tpu.memory_space<vmem>>, vector<1x128xf32>
    %25 = vector.broadcast %24 : vector<1x128xf32> to vector<8x128xf32>
    %26 = arith.addf %23, %25 : vector<8x128xf32>
    %cst_23 = arith.constant 0.000000e+00 : f32
    %27 = vector.broadcast %cst_23 : f32 to vector<8x128xf32>
    %28 = arith.maximumf %26, %27 : vector<8x128xf32>
    %c0_24 = arith.constant 0 : index
    %c0_25 = arith.constant 0 : index
    %29 = vector.load %arg10[%c0_24, %c0_25] : memref<128x128xf32, #tpu.memory_space<vmem>>, vector<128x128xf32>
    %cst_26 = arith.constant dense<0.000000e+00> : vector<8x128xf32>
    %30 = tpu.matmul %28, %29, %cst_26 {dimension_numbers = #tpu.dot_dimension_numbers<[1], [0], [0], [1], [0, 0, 1, 1], [], []>} : vector<8x128xf32>, vector<128x128xf32>, vector<8x128xf32> -> vector<8x128xf32>
    %c0_27 = arith.constant 0 : index
    %c0_28 = arith.constant 0 : index
    %31 = vector.load %arg11[%c0_27, %c0_28] : memref<1x128xf32, #tpu.memory_space<vmem>>, vector<1x128xf32>
    %32 = vector.broadcast %31 : vector<1x128xf32> to vector<8x128xf32>
    %33 = arith.addf %30, %32 : vector<8x128xf32>
    %cst_29 = arith.constant 0.000000e+00 : f32
    %34 = vector.broadcast %cst_29 : f32 to vector<8x128xf32>
    %35 = arith.maximumf %33, %34 : vector<8x128xf32>
    %c0_30 = arith.constant 0 : index
    %c0_31 = arith.constant 0 : index
    %36 = vector.load %arg12[%c0_30, %c0_31] : memref<128x128xf32, #tpu.memory_space<vmem>>, vector<128x128xf32>
    %cst_32 = arith.constant dense<0.000000e+00> : vector<8x128xf32>
    %37 = tpu.matmul %35, %36, %cst_32 {dimension_numbers = #tpu.dot_dimension_numbers<[1], [0], [0], [1], [0, 0, 1, 1], [], []>} : vector<8x128xf32>, vector<128x128xf32>, vector<8x128xf32> -> vector<8x128xf32>
    %c0_33 = arith.constant 0 : index
    %c0_34 = arith.constant 0 : index
    %38 = vector.load %arg13[%c0_33, %c0_34] : memref<1x128xf32, #tpu.memory_space<vmem>>, vector<1x128xf32>
    %39 = vector.broadcast %38 : vector<1x128xf32> to vector<8x128xf32>
    %40 = arith.addf %37, %39 : vector<8x128xf32>
    %c0_35 = arith.constant 0 : index
    %c0_36 = arith.constant 0 : index
    %41 = vector.load %arg14[%c0_35, %c0_36] : memref<8x128xf32, #tpu.memory_space<vmem>>, vector<8x128xf32>
    tpu.vector_store %arg14[%c0_35, %c0_36], %40 {strides = array<i32>} : memref<8x128xf32, #tpu.memory_space<vmem>>, vector<8x128xf32>,
    return
  }
  func.func @transform_0(%arg0: i32) -> (i32, i32) {
    %c0_i32 = arith.constant 0 : i32
    %c0_i32_0 = arith.constant 0 : i32
    return %arg0, %c0_i32 : i32, i32
  }
  func.func @transform_1(%arg0: i32) -> (i32, i32) {
    %c0_i32 = arith.constant 0 : i32
    %c0_i32_0 = arith.constant 0 : i32
    %c0_i32_1 = arith.constant 0 : i32
    return %c0_i32, %c0_i32_0 : i32, i32
  }
  func.func @transform_2(%arg0: i32) -> (i32, i32) {
    %c0_i32 = arith.constant 0 : i32
    %c0_i32_0 = arith.constant 0 : i32
    %c0_i32_1 = arith.constant 0 : i32
    return %c0_i32, %c0_i32_0 : i32, i32
  }
  func.func @transform_3(%arg0: i32) -> (i32, i32) {
    %c0_i32 = arith.constant 0 : i32
    %c0_i32_0 = arith.constant 0 : i32
    %c0_i32_1 = arith.constant 0 : i32
    return %c0_i32, %c0_i32_0 : i32, i32
  }
  func.func @transform_4(%arg0: i32) -> (i32, i32) {
    %c0_i32 = arith.constant 0 : i32
    %c0_i32_0 = arith.constant 0 : i32
    %c0_i32_1 = arith.constant 0 : i32
    return %c0_i32, %c0_i32_0 : i32, i32
  }
  func.func @transform_5(%arg0: i32) -> (i32, i32) {
    %c0_i32 = arith.constant 0 : i32
    %c0_i32_0 = arith.constant 0 : i32
    %c0_i32_1 = arith.constant 0 : i32
    return %c0_i32, %c0_i32_0 : i32, i32
  }
  func.func @transform_6(%arg0: i32) -> (i32, i32) {
    %c0_i32 = arith.constant 0 : i32
    %c0_i32_0 = arith.constant 0 : i32
    %c0_i32_1 = arith.constant 0 : i32
    return %c0_i32, %c0_i32_0 : i32, i32
  }
  func.func @transform_7(%arg0: i32) -> (i32, i32) {
    %c0_i32 = arith.constant 0 : i32
    %c0_i32_0 = arith.constant 0 : i32
    %c0_i32_1 = arith.constant 0 : i32
    return %c0_i32, %c0_i32_0 : i32, i32
  }
  func.func @transform_8(%arg0: i32) -> (i32, i32) {
    %c0_i32 = arith.constant 0 : i32
    %c0_i32_0 = arith.constant 0 : i32
    %c0_i32_1 = arith.constant 0 : i32
    return %c0_i32, %c0_i32_0 : i32, i32
  }
  func.func @transform_9(%arg0: i32) -> (i32, i32) {
    %c0_i32 = arith.constant 0 : i32
    %c0_i32_0 = arith.constant 0 : i32
    %c0_i32_1 = arith.constant 0 : i32
    return %c0_i32, %c0_i32_0 : i32, i32
  }
  func.func @transform_10(%arg0: i32) -> (i32, i32) {
    %c0_i32 = arith.constant 0 : i32
    %c0_i32_0 = arith.constant 0 : i32
    %c0_i32_1 = arith.constant 0 : i32
    return %c0_i32, %c0_i32_0 : i32, i32
  }
  func.func @transform_11(%arg0: i32) -> (i32, i32) {
    %c0_i32 = arith.constant 0 : i32
    %c0_i32_0 = arith.constant 0 : i32
    %c0_i32_1 = arith.constant 0 : i32
    return %c0_i32, %c0_i32_0 : i32, i32
  }
  func.func @transform_12(%arg0: i32) -> (i32, i32) {
    %c0_i32 = arith.constant 0 : i32
    %c0_i32_0 = arith.constant 0 : i32
    %c0_i32_1 = arith.constant 0 : i32
    return %c0_i32, %c0_i32_0 : i32, i32
  }
  func.func @transform_13(%arg0: i32) -> (i32, i32) {
    %c0_i32 = arith.constant 0 : i32
    %c0_i32_0 = arith.constant 0 : i32
    return %arg0, %c0_i32 : i32, i32
  }
}

</mosaic_0001>

<bundles_post_ra>
// kernel: _icm_forward_padded.1
= control target key start
LH: loop header
LB: loop body
LE: loop exit
PB: predicated region body
PF: predicated region fallthrough
CT: control target
= control target key end

     0   :  { %18 = vsyncpa [#allocation3], 0  ;;  %s727_s0 = inlined_call_operand.hbm [shape: f32[8,16], index: 0, kind: input, shape index: {}]   ;;  %s728_s1 = inlined_call_operand.hbm [shape: f32[16,128], index: 1, kind: input, shape index: {}]   ;;  %s729_s2 = inlined_call_operand.vmem [shape: f32[1,128], index: 2, kind: input, shape index: {}]   ;;  %s730_s3 = inlined_call_operand.hbm [shape: f32[128,128], index: 3, kind: input, shape index: {}]   ;;  %s731_s4 = inlined_call_operand.vmem [shape: f32[1,128], index: 4, kind: input, shape index: {}]   ;;  %s732_s5 = inlined_call_operand.hbm [shape: f32[128,128], index: 5, kind: input, shape index: {}]   ;;  %s733_s6 = inlined_call_operand.vmem [shape: f32[1,128], index: 6, kind: input, shape index: {}]   ;;  %s734_s7 = inlined_call_operand.hbm [shape: f32[128,128], index: 7, kind: input, shape index: {}]   ;;  %s735_s8 = inlined_call_operand.vmem [shape: f32[1,128], index: 8, kind: input, shape index: {}]   ;;  %s736_s9 = inlined_call_operand.hbm [shape: f32[128,128], index: 9, kind: input, shape index: {}]   ;;  %s737_s10 = inlined_call_operand.vmem [shape: f32[1,128], index: 10, kind: input, shape index: {}]   ;;  %s738_s11 = inlined_call_operand.hbm [shape: f32[128,128], index: 11, kind: input, shape index: {}]   ;;  %s739_s12 = inlined_call_operand.vmem [shape: f32[1,128], index: 12, kind: input, shape index: {}]   ;;  %s740_s13 = inlined_call_operand.vmem [shape: f32[8,128], index: 13, kind: output, shape index: {}]  }
   0x1   :  { %19 = vsyncpa [#allocation5], 0 }
   0x2   :  { %20 = vsyncpa [#allocation8], 0  ;;  %s37_s27 = sshll.u32 %s728_s1, 4  ;;  %s38_s27 = int_to_ptr.hbm [resolvable:$true] %s37_s27 }
   0x3   :  { %21 = vsyncpa [#allocation11], 0  ;;  %s588_s28 = smov [#allocation4]   ;;  %s67_s15 = sshll.u32 %s732_s5, 4  ;;  %s68_s15 = int_to_ptr.hbm [resolvable:$true] %s67_s15 }
   0x4   :  { %s39_s29 = sshll.u32 %s588_s28, 4  ;;  %s589_s16 = smov 128   ;;  %s40_s29 = int_to_ptr.vmem [resolvable:$true] %s39_s29 }
   0x5   :  { %s590_s17 = smov 8   ;;  %s591_s18 = smov [#allocation7]  }
   0x6   :  { %45 = dma.hbm_to_vmem [thread:$0]  %s38_s27, 256, %s40_s29, [#allocation5], %s589_s16, %s589_s16, %s590_s17  }
   0x7   :  { %s69_s19 = sshll.u32 %s591_s18, 4  ;;  %s97_s21 = sshll.u32 %s736_s9, 4  ;;  %s70_s19 = int_to_ptr.vmem [resolvable:$true] %s69_s19  ;;  %s98_s21 = int_to_ptr.hbm [resolvable:$true] %s97_s21 }
   0x8   :  { %75 = dma.hbm_to_vmem [thread:$0]  %s68_s15, 2048, %s70_s19, [#allocation8], %s589_s16, %s589_s16, %s590_s17  }
   0x9   :  { %s27_s23 = sshll.u32 %s727_s0, 4  ;;  %s592_s24 = smov [#allocation10]   ;;  %s28_s23 = int_to_ptr.hbm [resolvable:$true] %s27_s23 }
   0xa   :  { %s99_s25 = sshll.u32 %s592_s24, 4  ;;  %s593_s26 = smov [#allocation2]   ;;  %s100_s25 = int_to_ptr.vmem [resolvable:$true] %s99_s25 }
   0xb   :  { %105 = dma.hbm_to_vmem [thread:$0]  %s98_s21, 2048, %s100_s25, [#allocation11], %s589_s16, %s589_s16, %s590_s17  }
   0xc   :  { %s29_s9 = sshll.u32 %s593_s26, 4  ;;  %s52_s29 = sshll.u32 %s730_s3, 4  ;;  %s30_s9 = int_to_ptr.vmem [resolvable:$true] %s29_s9  ;;  %s53_s29 = int_to_ptr.hbm [resolvable:$true] %s52_s29 }
   0xd   :  { %32 = dma.hbm_to_vmem [thread:$0]  %s28_s23, 128, %s30_s9, [#allocation3]  }
   0xe   :  { %s82_s0 = sshll.u32 %s734_s7, 4  ;;  %s594_s15 = smov [#allocation6]   ;;  %s83_s0 = int_to_ptr.hbm [resolvable:$true] %s82_s0 }
   0xf   :  { %s54_s18 = sshll.u32 %s594_s15, 4  ;;  %s595_s19 = smov [#allocation9]   ;;  %s55_s18 = int_to_ptr.vmem [resolvable:$true] %s54_s18 }
  0x10   :  { %60 = dma.hbm_to_vmem [thread:$0]  %s53_s29, 2048, %s55_s18, [#allocation5], %s589_s16, %s589_s16, %s590_s17  }
  0x11   :  { %s84_s20 = sshll.u32 %s595_s19, 4  ;;  %s112_s3 = sshll.u32 %s738_s11, 4  ;;  %s85_s20 = int_to_ptr.vmem [resolvable:$true] %s84_s20  ;;  %s113_s3 = int_to_ptr.hbm [resolvable:$true] %s112_s3 }
  0x12   :  { %90 = dma.hbm_to_vmem [thread:$0]  %s83_s0, 2048, %s85_s20, [#allocation8], %s589_s16, %s589_s16, %s590_s17  }
  0x13   :  { %s596_s7 = smov [#allocation12]  }
  0x14   :  { %s114_s5 = sshll.u32 %s596_s7, 4  ;;  %s115_s5 = int_to_ptr.vmem [resolvable:$true] %s114_s5 }
  0x15   :  { %120 = dma.hbm_to_vmem [thread:$0]  %s113_s3, 2048, %s115_s5, [#allocation11], %s589_s16, %s589_s16, %s590_s17  }
  0x16   :  { %580 = dma.done.wait [#allocation3], 128  }
  0x17   :  { %581 = vsyncadd [#allocation3], 4294967168 }
  0x18   :  { %582 = dma.done.wait [#allocation5], 2304  }
  0x19   :  { %583 = vsyncadd [#allocation5], 4294964992 }
  0x1a   :  { %584 = dma.done.wait [#allocation8], 4096  }
  0x1b   :  { %585 = vsyncadd [#allocation8], 4294963200 }
  0x1c   :  { %586 = dma.done.wait [#allocation11], 4096  }
  0x1d   :  { %587 = vsyncadd [#allocation11], 4294963200  ;;  %v153_v0 = vld [vmem:[#allocation4 + $0x8] sm:$0xff]  ;;  %v152_v1 = vld [vmem:[#allocation4] sm:$0xff]  ;;  %vm158_vm0 = vcmask 130048  }
  0x1e   :  { %176 = vmatpush.msra.mxu0 %v153_v0  ;;  %v151_v2 = vld [vmem:[#allocation2] sm:$0xff]  ;;  %v198_v3 = vld [vmem:[#allocation6 + $0x78] sm:$0xff]  ;;  %v197_v4 = vld [vmem:[#allocation6 + $0x70] sm:$0xff] }
  0x1f   :  { %203 = vmatpush.msra.mxu1 %v198_v3  ;;  %v196_v5 = vld [vmem:[#allocation6 + $0x68] sm:$0xff]  ;;  %v195_v6 = vld [vmem:[#allocation6 + $0x60] sm:$0xff]  ;;  %v194_v7 = vld [vmem:[#allocation6 + $0x58] sm:$0xff] }
  0x20   :  { %177 = vmatpush.msra.mxu0 %v152_v1  ;;  %v193_v8 = vld [vmem:[#allocation6 + $0x50] sm:$0xff]  ;;  %v192_v9 = vld [vmem:[#allocation6 + $0x48] sm:$0xff]  ;;  %v191_v10 = vld [vmem:[#allocation6 + $0x40] sm:$0xff] }
  0x21   :  { %396 = vmatmul.msk.f32.vlgmr.msra.gmra.mxu0 %vm158_vm0, %v151_v2  ;;  %204 = vmatpush.msra.mxu1 %v197_v4  ;;  %v190_v11 = vld [vmem:[#allocation6 + $0x38] sm:$0xff]  ;;  %v189_v12 = vld [vmem:[#allocation6 + $0x30] sm:$0xff]  ;;  %v188_v13 = vld [vmem:[#allocation6 + $0x28] sm:$0xff] }
  0x22   :  { %v187_v14 = vld [vmem:[#allocation6 + $0x20] sm:$0xff]  ;;  %v186_v15 = vld [vmem:[#allocation6 + $0x18] sm:$0xff]  ;;  %v185_v16 = vld [vmem:[#allocation6 + $0x10] sm:$0xff] }
  0x23   :  { %205 = vmatpush.msra.mxu1 %v196_v5  ;;  %v184_v17 = vld [vmem:[#allocation6 + $0x8] sm:$0xff]  ;;  %v183_v18 = vld [vmem:[#allocation6] sm:$0xff]  ;;  %v239_v19 = vld [vmem:[#allocation7 + $0x78] sm:$0xff] }
  0x24   :  { %v238_v20 = vld [vmem:[#allocation7 + $0x70] sm:$0xff]  ;;  %244 = vmatpush.msra.mxu2 %v239_v19  ;;  %v237_v21 = vld [vmem:[#allocation7 + $0x68] sm:$0xff]  ;;  %v236_v22 = vld [vmem:[#allocation7 + $0x60] sm:$0xff] }
  0x25   :  { %206 = vmatpush.msra.mxu1 %v195_v6  ;;  %v235_v23 = vld [vmem:[#allocation7 + $0x58] sm:$0xff]  ;;  %v234_v24 = vld [vmem:[#allocation7 + $0x50] sm:$0xff]  ;;  %v233_v25 = vld [vmem:[#allocation7 + $0x48] sm:$0xff] }
  0x26   :  { %245 = vmatpush.msra.mxu2 %v238_v20  ;;  %v232_v26 = vld [vmem:[#allocation7 + $0x40] sm:$0xff]  ;;  %v231_v27 = vld [vmem:[#allocation7 + $0x38] sm:$0xff]  ;;  %v230_v28 = vld [vmem:[#allocation7 + $0x30] sm:$0xff] }
  0x27   :  { %207 = vmatpush.msra.mxu1 %v194_v7  ;;  %v229_v29 = vld [vmem:[#allocation7 + $0x28] sm:$0xff]  ;;  %v228_v30 = vld [vmem:[#allocation7 + $0x20] sm:$0xff]  ;;  %v227_v31 = vld [vmem:[#allocation7 + $0x18] sm:$0xff] }
  0x28   :  { %246 = vmatpush.msra.mxu2 %v237_v21  ;;  %v406_v32 = vld [vmem:[%s729_s2] ss:$0 sm:$0xff]  ;;  %v226_v36 = vld [vmem:[#allocation7 + $0x10] sm:$0xff]  ;;  %v224_v38 = vld [vmem:[#allocation7] sm:$0xff] }
  0x29   :  { %208 = vmatpush.msra.mxu1 %v193_v8  ;;  %v225_v37 = vld [vmem:[#allocation7 + $0x8] sm:$0xff]  ;;  %v280_v39 = vld [vmem:[#allocation9 + $0x78] sm:$0xff]  ;;  %v279_v40 = vld [vmem:[#allocation9 + $0x70] sm:$0xff] }
  0x2a   :  { %247 = vmatpush.msra.mxu2 %v236_v22  ;;  %285 = vmatpush.msra.mxu3 %v280_v39  ;;  %v278_v41 = vld [vmem:[#allocation9 + $0x68] sm:$0xff]  ;;  %v277_v42 = vld [vmem:[#allocation9 + $0x60] sm:$0xff]  ;;  %v276_v43 = vld [vmem:[#allocation9 + $0x58] sm:$0xff] }
  0x2b   :  { %209 = vmatpush.msra.mxu1 %v192_v9  ;;  %v275_v44 = vld [vmem:[#allocation9 + $0x50] sm:$0xff]  ;;  %v274_v45 = vld [vmem:[#allocation9 + $0x48] sm:$0xff]  ;;  %v273_v46 = vld [vmem:[#allocation9 + $0x40] sm:$0xff] }
  0x2c   :  { %248 = vmatpush.msra.mxu2 %v235_v23  ;;  %286 = vmatpush.msra.mxu3 %v279_v40  ;;  %v272_v47 = vld [vmem:[#allocation9 + $0x38] sm:$0xff]  ;;  %v271_v48 = vld [vmem:[#allocation9 + $0x30] sm:$0xff]  ;;  %v270_v49 = vld [vmem:[#allocation9 + $0x28] sm:$0xff] }
  0x2d   :  { %210 = vmatpush.msra.mxu1 %v191_v10  ;;  %v269_v50 = vld [vmem:[#allocation9 + $0x20] sm:$0xff]  ;;  %v268_v51 = vld [vmem:[#allocation9 + $0x18] sm:$0xff]  ;;  %v407_v52 = vld [vmem:[%s731_s4] ss:$0 sm:$0xff] }
  0x2e   :  { %249 = vmatpush.msra.mxu2 %v234_v24  ;;  %287 = vmatpush.msra.mxu3 %v278_v41  ;;  %v267_v56 = vld [vmem:[#allocation9 + $0x10] sm:$0xff]  ;;  %v266_v57 = vld [vmem:[#allocation9 + $0x8] sm:$0xff]  ;;  %v265_v58 = vld [vmem:[#allocation9] sm:$0xff] }
  0x2f   :  { %211 = vmatpush.msra.mxu1 %v190_v11  ;;  %v321_v59 = vld [vmem:[#allocation10 + $0x78] sm:$0xff]  ;;  %v320_v60 = vld [vmem:[#allocation10 + $0x70] sm:$0xff]  ;;  %v319_v61 = vld [vmem:[#allocation10 + $0x68] sm:$0xff] }
  0x30   :  { %250 = vmatpush.msra.mxu2 %v233_v25  ;;  %288 = vmatpush.msra.mxu3 %v277_v42  ;;  %v318_v62 = vld [vmem:[#allocation10 + $0x60] sm:$0xff]  ;;  %v317_v63 = vld [vmem:[#allocation10 + $0x58] sm:$0xff]  ;;  %v316_v0 = vld [vmem:[#allocation10 + $0x50] sm:$0xff] }
  0x31   :  { %212 = vmatpush.msra.mxu1 %v189_v12  ;;  %326 = vmatpush.msrb.mxu0 %v321_v59  ;;  %v315_v1 = vld [vmem:[#allocation10 + $0x48] sm:$0xff]  ;;  %v314_v2 = vld [vmem:[#allocation10 + $0x40] sm:$0xff]  ;;  %v313_v3 = vld [vmem:[#allocation10 + $0x38] sm:$0xff] }
  0x32   :  { %251 = vmatpush.msra.mxu2 %v232_v26  ;;  %289 = vmatpush.msra.mxu3 %v276_v43  ;;  %v312_v4 = vld [vmem:[#allocation10 + $0x30] sm:$0xff]  ;;  %v311_v5 = vld [vmem:[#allocation10 + $0x28] sm:$0xff]  ;;  %v310_v6 = vld [vmem:[#allocation10 + $0x20] sm:$0xff] }
  0x33   :  { %213 = vmatpush.msra.mxu1 %v188_v13  ;;  %327 = vmatpush.msrb.mxu0 %v320_v60  ;;  %v309_v7 = vld [vmem:[#allocation10 + $0x18] sm:$0xff]  ;;  %v408_v8 = vld [vmem:[%s733_s6] ss:$0 sm:$0xff]  ;;  %v308_v12 = vld [vmem:[#allocation10 + $0x10] sm:$0xff] }
  0x34   :  { %252 = vmatpush.msra.mxu2 %v231_v27  ;;  %290 = vmatpush.msra.mxu3 %v275_v44  ;;  %v307_v13 = vld [vmem:[#allocation10 + $0x8] sm:$0xff]  ;;  %v358_v19 = vld [vmem:[#allocation12 + $0x58] sm:$0xff]  ;;  %v357_v20 = vld [vmem:[#allocation12 + $0x50] sm:$0xff] }
  0x35   :  { %214 = vmatpush.msra.mxu1 %v187_v14  ;;  %328 = vmatpush.msrb.mxu0 %v319_v61  ;;  %v306_v14 = vld [vmem:[#allocation10] sm:$0xff]  ;;  %v356_v21 = vld [vmem:[#allocation12 + $0x48] sm:$0xff]  ;;  %v354_v23 = vld [vmem:[#allocation12 + $0x38] sm:$0xff] }
  0x36   :  { %253 = vmatpush.msra.mxu2 %v230_v28  ;;  %291 = vmatpush.msra.mxu3 %v274_v45  ;;  %v355_v22 = vld [vmem:[#allocation12 + $0x40] sm:$0xff]  ;;  %v353_v24 = vld [vmem:[#allocation12 + $0x30] sm:$0xff]  ;;  %v352_v25 = vld [vmem:[#allocation12 + $0x28] sm:$0xff] }
  0x37   :  { %215 = vmatpush.msra.mxu1 %v186_v15  ;;  %329 = vmatpush.msrb.mxu0 %v318_v62  ;;  %v362_v15 = vld [vmem:[#allocation12 + $0x78] sm:$0xff]  ;;  %v351_v26 = vld [vmem:[#allocation12 + $0x20] sm:$0xff]  ;;  %v409_v28 = vld [vmem:[%s735_s8] ss:$0 sm:$0xff] }
  0x38   :  { %254 = vmatpush.msra.mxu2 %v229_v29  ;;  %292 = vmatpush.msra.mxu3 %v273_v46  ;;  %v350_v27 = vld [vmem:[#allocation12 + $0x18] sm:$0xff]  ;;  %v411_v39 = vld [vmem:[%s739_s12] ss:$0 sm:$0xff] }
  0x39   :  { %216 = vmatpush.msra.mxu1 %v185_v16  ;;  %330 = vmatpush.msrb.mxu0 %v317_v63  ;;  %v361_v16 = vld [vmem:[#allocation12 + $0x70] sm:$0xff] }
  0x3a   :  { %255 = vmatpush.msra.mxu2 %v228_v30  ;;  %293 = vmatpush.msra.mxu3 %v272_v47 }
  0x3b   :  { %217 = vmatpush.msra.mxu1 %v184_v17  ;;  %331 = vmatpush.msrb.mxu0 %v316_v0  ;;  %v360_v17 = vld [vmem:[#allocation12 + $0x68] sm:$0xff] }
  0x3c   :  { %256 = vmatpush.msra.mxu2 %v227_v31  ;;  %294 = vmatpush.msra.mxu3 %v271_v48 }
  0x3d   :  { %218 = vmatpush.msra.mxu1 %v183_v18  ;;  %332 = vmatpush.msrb.mxu0 %v315_v1  ;;  %v359_v18 = vld [vmem:[#allocation12 + $0x60] sm:$0xff] }
  0x3e   :  { %257 = vmatpush.msra.mxu2 %v226_v36  ;;  %295 = vmatpush.msra.mxu3 %v270_v49 }
  0x3f   :  { %333 = vmatpush.msrb.mxu0 %v314_v2  ;;  %367 = vmatpush.msrb.mxu1 %v362_v15 }
  0x40   :  { %258 = vmatpush.msra.mxu2 %v225_v37  ;;  %296 = vmatpush.msra.mxu3 %v269_v50 }
  0x41   :  { %334 = vmatpush.msrb.mxu0 %v313_v3  ;;  %368 = vmatpush.msrb.mxu1 %v361_v16 }
  0x42   :  { %259 = vmatpush.msra.mxu2 %v224_v38  ;;  %297 = vmatpush.msra.mxu3 %v268_v51 }
  0x43   :  { %335 = vmatpush.msrb.mxu0 %v312_v4  ;;  %369 = vmatpush.msrb.mxu1 %v360_v17 }
  0x44   :  { %298 = vmatpush.msra.mxu3 %v267_v56 }
  0x45   :  { %336 = vmatpush.msrb.mxu0 %v311_v5  ;;  %370 = vmatpush.msrb.mxu1 %v359_v18 }
  0x46   :  { %299 = vmatpush.msra.mxu3 %v266_v57 }
  0x47   :  { %337 = vmatpush.msrb.mxu0 %v310_v6  ;;  %371 = vmatpush.msrb.mxu1 %v358_v19 }
  0x48   :  { %300 = vmatpush.msra.mxu3 %v265_v58 }
  0x49   :  { %338 = vmatpush.msrb.mxu0 %v309_v7  ;;  %372 = vmatpush.msrb.mxu1 %v357_v20 }
  0x4b   :  { %339 = vmatpush.msrb.mxu0 %v308_v12  ;;  %373 = vmatpush.msrb.mxu1 %v356_v21 }
  0x4d   :  { %340 = vmatpush.msrb.mxu0 %v307_v13  ;;  %374 = vmatpush.msrb.mxu1 %v355_v22 }
  0x4f   :  { %341 = vmatpush.msrb.mxu0 %v306_v14  ;;  %375 = vmatpush.msrb.mxu1 %v354_v23 }
  0x51   :  { %376 = vmatpush.msrb.mxu1 %v353_v24 }
  0x53   :  { %377 = vmatpush.msrb.mxu1 %v352_v25 }
  0x55   :  { %378 = vmatpush.msrb.mxu1 %v351_v26 }
  0x57   :  { %379 = vmatpush.msrb.mxu1 %v350_v27 }
  0x9e   :  { %v179_v33 = vpop.f32.mrf.mxu0 }
  0x9f   :  { %v180_v34 = vadd.f32 %v406_v32, %v179_v33  ;;  %v349_v32 = vld [vmem:[#allocation12 + $0x10] sm:$0xff]  ;;  %v348_v33 = vld [vmem:[#allocation12 + $0x8] sm:$0xff] }
  0xa0   :  { %380 = vmatpush.msrb.mxu1 %v349_v32 }
  0xa1   :  { %v182_v35 = vmax.f32 %v180_v34, 0.0  ;;  %v347_v34 = vld [vmem:[#allocation12] sm:$0xff] }
  0xa2   :  { %381 = vmatpush.msrb.mxu1 %v348_v33 }
  0xa3   :  { %219 = vmatmul.f32.vlgmr.msra.gmra.mxu1 %v182_v35  ;;  %v410_v35 = vld [vmem:[%s737_s10] ss:$0 sm:$0xff] }
  0xa4   :  { %382 = vmatpush.msrb.mxu1 %v347_v34 }
 0x120   :  { %v220_v53 = vpop.f32.mrf.mxu1 }
 0x121   :  { %v221_v54 = vadd.f32 %v407_v52, %v220_v53 }
 0x123   :  { %v223_v55 = vmax.f32 %v221_v54, 0.0 }
 0x125   :  { %260 = vmatmul.f32.vlgmr.msra.gmra.mxu2 %v223_v55 }
 0x1a8   :  { %v261_v9 = vpop.f32.mrf.mxu2 }
 0x1a9   :  { %v262_v10 = vadd.f32 %v408_v8, %v261_v9 }
 0x1ab   :  { %v264_v11 = vmax.f32 %v262_v10, 0.0 }
 0x1ad   :  { %301 = vmatmul.f32.vlgmr.msra.gmra.mxu3 %v264_v11 }
 0x230   :  { %v302_v29 = vpop.f32.mrf.mxu3 }
 0x231   :  { %v303_v30 = vadd.f32 %v409_v28, %v302_v29 }
 0x233   :  { %v305_v31 = vmax.f32 %v303_v30, 0.0 }
 0x235   :  { %342 = vmatmul.f32.vlgmr.msrb.gmra.mxu0 %v305_v31 }
 0x2b2   :  { %v343_v36 = vpop.f32.mrf.mxu0 }
 0x2b3   :  { %v344_v37 = vadd.f32 %v410_v35, %v343_v36 }
 0x2b5   :  { %v346_v38 = vmax.f32 %v344_v37, 0.0 }
 0x2b7   :  { %383 = vmatmul.f32.vlgmr.msrb.gmra.mxu1 %v346_v38 }
 0x334   :  { %v384_v40 = vpop.f32.mrf.mxu1 }
 0x335   :  { %v385_v41 = vadd.f32 %v411_v39, %v384_v40 }
 0x337   :  { %387 = vst [vmem:[%s740_s13] sm:$0xff] %v385_v41 }
 0x338   :  { %392 = vsyncpa [#allocation3], 1 }
 0x339   :  { %393 = vsyncpa [#allocation5], 1 }
 0x33a   :  { %394 = vsyncpa [#allocation8], 1 }
 0x33b   :  { %395 = vsyncpa [#allocation11], 1 }

</bundles_post_ra>
